<compile_context>
chip_gen: v6e
topology: v6e:2x2x1
jax: 0.10.0
libtpu: 0.0.40
codegen_flags: <defaults>
</compile_context>

<pallas_src>
import jax
import jax.numpy as jnp
from jax.experimental import pallas as pl
from jax.experimental.pallas import tpu as pltpu

MARGIN = 2.0
PAIRWISE_EPS = 1e-6      # torch F.pairwise_distance default eps
LANE = 128
SUBLANE = 8


def _round_up(x, m):
    return ((x + m - 1) // m) * m


def _num_tensorcores():
    """2 on v7x (two TensorCores per chip), 1 on v5e/v6e/unknown."""
    try:
        kind = jax.devices()[0].device_kind.lower()
    except Exception:
        return 1
    return 2 if ("v7" in kind or "7x" in kind) else 1


# --------------------------- SiameseNetwork forward head --------------------------- #

def _siamese_head_kernel(x_ref, w_ref, b_ref, out_ref):
    # Single MXU matmul (fc1 and fc2 folded in the wrapper): bf16 operands, f32 accumulation.
    h = jnp.dot(x_ref[...], w_ref[...], preferred_element_type=jnp.float32) + b_ref[...]
    out_ref[...] = h[:, :out_ref.shape[1]]          # drop the weight's lane padding on store


def siamese_head(features, w1, b1, w2, b2):
    """features: (B, 2048) flattened resnet features -> (B, 5) embedding (fc1 -> fc2)."""
    B, F = features.shape
    H = w1.shape[1]
    O = w2.shape[1]
    assert w1.shape == (F, H) and b1.shape == (H,)
    assert w2.shape == (H, O) and b2.shape == (O,)

    # fc2(fc1(x)) is purely linear -> fold once at trace time in f32 (HIGHEST), then feed the
    # folded (F, O) weight to the kernel in bf16.  Bias stays f32 (added after f32 accumulate).
    w_folded = jnp.dot(w1.astype(jnp.float32), w2.astype(jnp.float32),
                       precision=jax.lax.Precision.HIGHEST)                            # (F, O)
    b_folded = jnp.dot(b1.astype(jnp.float32), w2.astype(jnp.float32),
                       precision=jax.lax.Precision.HIGHEST) + b2.astype(jnp.float32)   # (O,)

    O_pad = _round_up(O, LANE)                 # lane-dense weight for the MXU
    TBM = min(1024, _round_up(B, 16))          # bf16 tile: 16-row sublane packing
    B_pad = _round_up(B, TBM)

    x = jnp.pad(features.astype(jnp.bfloat16), ((0, B_pad - B), (0, 0)))
    wp = jnp.pad(w_folded, ((0, 0), (0, O_pad - O))).astype(jnp.bfloat16)
    bp = jnp.pad(b_folded.reshape(1, O), ((0, 0), (0, O_pad - O)))

    out = pl.pallas_call(
        _siamese_head_kernel,
        out_shape=jax.ShapeDtypeStruct((B_pad, O), jnp.float32),
        grid=(B_pad // TBM,),
        in_specs=[
            pl.BlockSpec((TBM, F), lambda i: (i, 0)),        # streamed activations (bf16)
            pl.BlockSpec((F, O_pad), lambda i: (0, 0)),      # resident folded weight (bf16)
            pl.BlockSpec((1, O_pad), lambda i: (0, 0)),      # resident folded bias (f32)
        ],
        out_specs=pl.BlockSpec((TBM, O), lambda i: (i, 0)),  # un-padded (TBM, O) writeback
        compiler_params=pltpu.CompilerParams(dimension_semantics=("parallel",)),
    )(x, wp, bp)
    return out[:B]


# ------------------------------- contrastive loss ---------------------------------- #

def contrastive_loss(output1, output2, label, *, margin=MARGIN):
    """mean( (1-label)*d^2 + label*clamp(margin-d, 0)^2 ), d = ||o1 - o2 + eps||_2 per row.

    o1/o2 may be f32 or bf16; distance math runs in f32 in-kernel either way.
    """
    B, D = output1.shape
    assert output2.shape == (B, D)
    label = jnp.reshape(label, (B, 1)).astype(jnp.float32)

    # Batch tile: multiple of 16 rows (covers f32 & bf16 packing), ~2 MiB per o1/o2 buffer
    # (capped at 4096 rows), so the double-buffered o1 + o2 + label set stays inside every
    # generation's default scoped VMEM (v5e 16 MiB) while blocks are big enough to sit near
    # the HBM roofline and amortize the ~0.35 us per-grid-step overhead.
    itemsize = output1.dtype.itemsize
    vmem_row_bytes = _round_up(D, LANE) * itemsize          # VMEM rows are lane-padded
    SUB = 16
    tb = (2 * 1024 * 1024) // vmem_row_bytes
    tb = max(SUB, min(4096, (tb // SUB) * SUB))
    TB = min(tb, _round_up(B, SUB))

    num_cores = _num_tensorcores()                          # 2-way batch split only on v7x
    n_tiles = -(-B // TB)
    n_inner = -(-n_tiles // num_cores)
    B_pad = num_cores * n_inner * TB

    # Feature axis stays at its natural width D (full-dim BlockSpec exception): no lane
    # padding / no padded-copy materialization in HBM; only the batch is padded.
    o1 = jnp.pad(output1, ((0, B_pad - B), (0, 0)))
    o2 = jnp.pad(output2, ((0, B_pad - B), (0, 0)))
    lbl = jnp.pad(label, ((0, B_pad - B), (0, 0)))

    def kernel(o1_ref, o2_ref, lbl_ref, out_ref, acc_ref):
        c = pl.program_id(0)                 # "parallel" half-of-batch axis (both TCs on v7x)
        i = pl.program_id(1)                 # "arbitrary" reduction axis over batch tiles
        n_i = pl.num_programs(1)

        @pl.when(i == 0)
        def _init():
            acc_ref[...] = jnp.zeros_like(acc_ref)

        # f32 math even for bf16 inputs so PAIRWISE_EPS (1e-6) is not below dtype resolution.
        diff = (o1_ref[...].astype(jnp.float32)
                - o2_ref[...].astype(jnp.float32)) + PAIRWISE_EPS
        d2 = jnp.sum(diff * diff, axis=-1, keepdims=True)          # (TB, 1)
        d = jnp.sqrt(d2)
        lbl_t = lbl_ref[...]
        per_row = (1.0 - lbl_t) * d2 + lbl_t * jnp.square(jnp.maximum(margin - d, 0.0))

        # Mask padded / ragged batch rows so they contribute exactly zero to the sum.
        block = c * n_i + i
        row_ids = jax.lax.broadcasted_iota(jnp.int32, (TB, 1), 0) + block * TB
        per_row = jnp.where(row_ids < B, per_row, 0.0)

        acc_ref[...] += jnp.sum(per_row, axis=0, keepdims=True)    # (1,1) VMEM accumulator

        @pl.when(i == n_i - 1)               # single HBM writeback per core, on the last tile
        def _finalize():
            out_ref[...] = jnp.broadcast_to(acc_ref[...], out_ref.shape)

    partials = pl.pallas_call(
        kernel,
        out_shape=jax.ShapeDtypeStruct((num_cores * SUBLANE, LANE), jnp.float32),
        grid=(num_cores, n_inner),
        in_specs=[
            pl.BlockSpec((TB, D), lambda c, i: (c * n_inner + i, 0)),
            pl.BlockSpec((TB, D), lambda c, i: (c * n_inner + i, 0)),
            pl.BlockSpec((TB, 1), lambda c, i: (c * n_inner + i, 0)),
        ],
        out_specs=pl.BlockSpec((SUBLANE, LANE), lambda c, i: (c, 0)),
        scratch_shapes=[pltpu.VMEM((1, 1), jnp.float32)],
        # NOTE: on v7x, verify in xprof that the leading axis shards across both TensorCores;
        # if not, switch it to pltpu.CORE_PARALLEL.
        compiler_params=pltpu.CompilerParams(
            dimension_semantics=("parallel", "arbitrary")),
    )(o1, o2, lbl)

    # Sum the per-core partials and divide by the true batch size.
    return jnp.sum(partials[::SUBLANE, 0]) / B


def contrastive_loss_ref(output1, output2, label):
    diff = output1.astype(jnp.float32) - output2.astype(jnp.float32) + PAIRWISE_EPS
    d2 = jnp.sum(diff * diff, axis=-1, keepdims=True)
    d = jnp.sqrt(d2)
    lbl = jnp.reshape(label, (-1, 1)).astype(jnp.float32)
    return jnp.mean((1.0 - lbl) * d2 + lbl * jnp.square(jnp.maximum(MARGIN - d, 0.0)))


if __name__ == "__main__":
    key = jax.random.PRNGKey(0)
    ks = jax.random.split(key, 8)

    # ---- SiameseNetwork head: (B, 2048) resnet features -> fc1 -> fc2 -> (B, 5) ----
    B, FEAT, HID, OUT = 4, 2048, 128, 5

    def bf16_exact(k, shape, scale):
        # quantize through bf16 so the bf16-fed kernel sees its inputs exactly
        v = jax.random.normal(k, shape, jnp.float32) * scale
        return v.astype(jnp.bfloat16).astype(jnp.float32)

    feats1 = bf16_exact(ks[0], (B, FEAT), 1.0)
    feats2 = bf16_exact(ks[1], (B, FEAT), 1.0)
    w1 = bf16_exact(ks[2], (FEAT, HID), 1.0 / (FEAT ** 0.5))
    b1 = bf16_exact(ks[3], (HID,), 0.1)
    w2 = bf16_exact(ks[4], (HID, OUT), 1.0 / (HID ** 0.5))
    b2 = bf16_exact(ks[5], (OUT,), 0.1)

    out1 = siamese_head(feats1, w1, b1, w2, b2)
    out2 = siamese_head(feats2, w1, b1, w2, b2)
    out1, out2 = jax.block_until_ready((out1, out2))

    def head_ref(x):
        h = jnp.dot(x, w1, precision=jax.lax.Precision.HIGHEST) + b1
        return jnp.dot(h, w2, precision=jax.lax.Precision.HIGHEST) + b2

    assert out1.shape == (B, OUT) and out2.shape == (B, OUT)
    # loose tolerance: bf16 folded weight + bf16 MXU operands (f32 accumulate) vs two f32
    # HIGHEST-precision matmuls in the reference
    assert jnp.allclose(out1, head_ref(feats1), rtol=5e-2, atol=5e-2)
    assert jnp.allclose(out2, head_ref(feats2), rtol=5e-2, atol=5e-2)

    # ---- contrastive loss on the siamese embedding pair (f32, D=5, ragged batch) ----
    label_pair = jax.random.bernoulli(ks[6], 0.5, (B, 1)).astype(jnp.float32)
    loss_pair = jax.block_until_ready(contrastive_loss(out1, out2, label_pair))
    ref_pair = contrastive_loss_ref(out1, out2, label_pair)
    assert jnp.allclose(loss_pair, ref_pair, rtol=1e-4, atol=1e-5), (loss_pair, ref_pair)

    # ---- contrastive loss on bf16 embeddings (B=24 ragged across tiles, D=32) ----
    Bl, Dl = 24, 32
    o1 = jax.random.normal(ks[7], (Bl, Dl), jnp.float32).astype(jnp.bfloat16)
    o2 = jax.random.normal(jax.random.PRNGKey(1), (Bl, Dl), jnp.float32).astype(jnp.bfloat16)
    lb = jax.random.bernoulli(jax.random.PRNGKey(2), 0.5, (Bl, 1)).astype(jnp.float32)
    loss2 = jax.block_until_ready(contrastive_loss(o1, o2, lb))
    ref2 = contrastive_loss_ref(o1, o2, lb)
    assert jnp.allclose(loss2, ref2, rtol=1e-4, atol=1e-5), (loss2, ref2)

    print("KERNEL_OK")
</pallas_src>

<mosaic_0001>
module attributes {stable_mosaic.version = 11 : i64} {
  func.func @_siamese_head_kernel(%arg0: i32, %arg1: memref<16x2048xbf16, #tpu.memory_space<vmem>>, %arg2: memref<2048x128xbf16, #tpu.memory_space<vmem>>, %arg3: memref<1x128xf32, #tpu.memory_space<vmem>>, %arg4: memref<16x5xf32, #tpu.memory_space<vmem>>) attributes {dimension_semantics = [#tpu.dimension_semantics<parallel>], iteration_bounds = array<i64: 1>, scalar_prefetch = 0 : i64, scratch_operands = 0 : i64, tpu.core_type = #tpu.core_type<tc>, window_params = [{transform_indices = @transform_0, window_bounds = array<i64: 16, 2048>}, {pipeline_mode = #tpu.pipeline_mode<synchronous>, transform_indices = @transform_1, window_bounds = array<i64: 2048, 128>}, {pipeline_mode = #tpu.pipeline_mode<synchronous>, transform_indices = @transform_2, window_bounds = array<i64: 1, 128>}, {transform_indices = @transform_3, window_bounds = array<i64: 16, 5>}]} {
    %c0 = arith.constant 0 : index
    %c0_0 = arith.constant 0 : index
    %0 = vector.load %arg1[%c0, %c0_0] : memref<16x2048xbf16, #tpu.memory_space<vmem>>, vector<16x2048xbf16>
    %c0_1 = arith.constant 0 : index
    %c0_2 = arith.constant 0 : index
    %1 = vector.load %arg2[%c0_1, %c0_2] : memref<2048x128xbf16, #tpu.memory_space<vmem>>, vector<2048x128xbf16>
    %cst = arith.constant dense<0.000000e+00> : vector<16x128xf32>
    %2 = tpu.matmul %0, %1, %cst {dimension_numbers = #tpu.dot_dimension_numbers<[1], [0], [0], [1], [0, 0, 1, 1], [], []>} : vector<16x2048xbf16>, vector<2048x128xbf16>, vector<16x128xf32> -> vector<16x128xf32>
    %c0_3 = arith.constant 0 : index
    %c0_4 = arith.constant 0 : index
    %3 = vector.load %arg3[%c0_3, %c0_4] : memref<1x128xf32, #tpu.memory_space<vmem>>, vector<1x128xf32>
    %4 = vector.broadcast %3 : vector<1x128xf32> to vector<16x128xf32>
    %5 = arith.addf %2, %4 : vector<16x128xf32>
    %6 = vector.extract_strided_slice %5 {offsets = [0, 0], sizes = [16, 5], strides = [1, 1]} : vector<16x128xf32> to vector<16x5xf32>
    %c0_5 = arith.constant 0 : index
    %c0_6 = arith.constant 0 : index
    %7 = vector.load %arg4[%c0_5, %c0_6] : memref<16x5xf32, #tpu.memory_space<vmem>>, vector<16x5xf32>
    tpu.vector_store %arg4[%c0_5, %c0_6], %6 {strides = array<i32>} : memref<16x5xf32, #tpu.memory_space<vmem>>, vector<16x5xf32>,
    return
  }
  func.func @transform_0(%arg0: i32) -> (i32, i32) {
    %c0_i32 = arith.constant 0 : i32
    %c0_i32_0 = arith.constant 0 : i32
    return %arg0, %c0_i32 : i32, i32
  }
  func.func @transform_1(%arg0: i32) -> (i32, i32) {
    %c0_i32 = arith.constant 0 : i32
    %c0_i32_0 = arith.constant 0 : i32
    %c0_i32_1 = arith.constant 0 : i32
    return %c0_i32, %c0_i32_0 : i32, i32
  }
  func.func @transform_2(%arg0: i32) -> (i32, i32) {
    %c0_i32 = arith.constant 0 : i32
    %c0_i32_0 = arith.constant 0 : i32
    %c0_i32_1 = arith.constant 0 : i32
    return %c0_i32, %c0_i32_0 : i32, i32
  }
  func.func @transform_3(%arg0: i32) -> (i32, i32) {
    %c0_i32 = arith.constant 0 : i32
    %c0_i32_0 = arith.constant 0 : i32
    return %arg0, %c0_i32 : i32, i32
  }
}

</mosaic_0001>

<bundles_post_ra>
// kernel: tpu_custom_call.1
= control target key start
LH: loop header
LB: loop body
LE: loop exit
PB: predicated region body
PF: predicated region fallthrough
CT: control target
= control target key end

     0   :  { %8 = vsyncpa [#allocation3], 0  ;;  %s2045_s0 = inlined_call_operand.hbm [shape: bf16[16,2048], index: 0, kind: input, shape index: {}]   ;;  %s2046_s1 = inlined_call_operand.hbm [shape: bf16[2048,128], index: 1, kind: input, shape index: {}]   ;;  %s2047_s2 = inlined_call_operand.vmem [shape: f32[1,128], index: 2, kind: input, shape index: {}]   ;;  %s2048_s3 = inlined_call_operand.vmem [shape: f32[16,5], index: 3, kind: output, shape index: {}]  }
   0x1   :  { %9 = vsyncpa [#allocation5], 0  ;;  %s2005_s12 = smov [#allocation2]  }
   0x2   :  { %s15_s13 = sshll.u32 %s2005_s12, 4  ;;  %s16_s13 = int_to_ptr.vmem [resolvable:$true] %s15_s13 }
   0x3   :  { %s1969_s14 = scalar_lea.vmem %s16_s13, 2048  ;;  %p1974_p1 = scmp.lt.s32.totalorder %s16_s13, %s16_s13 }
   0x4   :  { %p1970_p0 = scmp.ne.s32.totalorder %s16_s13, %s1969_s14  ;;  %p1975_p2 = scmp.lt.s32.totalorder %s1969_s14, %s1969_s14 }
   0x6   :  { %p1976_p3 = por %p1975_p2, %p1974_p1 }
   0x8   :  { %p1977_p4 = pnand %p1976_p3, %p1970_p0 }
   0xa   :  { %1980 = shalt.err (!%p1977_p4)
}
   0xb   :  { %s2006_s15 = smov 1024   ;;  %s2007_s16 = smov 64  }
   0xc   :  { %21 = dma.hbm_to_vmem [thread:$0]  %s2045_s0, 2048, %s16_s13, [#allocation3], %s2006_s15, %s2006_s15, %s2007_s16  }
   0xd   :  { %s2008_s19 = smov [#allocation4]  }
   0xe   :  { %s27_s20 = sshll.u32 %s2008_s19, 4  ;;  %s28_s20 = int_to_ptr.vmem [resolvable:$true] %s27_s20 }
   0xf   :  { %s1989_s21 = scalar_lea.vmem %s28_s20, 16384  ;;  %p1994_p6 = scmp.lt.s32.totalorder %s28_s20, %s28_s20 }
  0x10   :  { %p1990_p5 = scmp.ne.s32.totalorder %s28_s20, %s1989_s21  ;;  %p1995_p7 = scmp.lt.s32.totalorder %s1989_s21, %s1989_s21 }
  0x12   :  { %p1996_p8 = por %p1995_p7, %p1994_p6 }
  0x14   :  { %p1997_p9 = pnand %p1996_p8, %p1990_p5 }
  0x16   :  { %2000 = shalt.err (!%p1997_p9)
}
  0x17   :  { %s2009_s22 = smov 4  }
  0x18   :  { %33 = dma.hbm_to_vmem [thread:$0]  %s2046_s1, 16384, %s28_s20, [#allocation5], %s2007_s16, %s2007_s16, %s2009_s22  }
  0x19   :  { %2001 = dma.done.wait [#allocation3], 2048  }
  0x1a   :  { %2002 = vsyncadd [#allocation3], 4294965248 }
  0x1b   :  { %2003 = dma.done.wait [#allocation5], 16384  }
  0x1c   :  { %2004 = vsyncadd [#allocation5], 4294950912  ;;  %v1833_v0 = vld [vmem:[#allocation4 + $0x78] sm:$0xff]   ;;  %v1837_v4 = vld [vmem:[#allocation4 + $0x70] sm:$0xff]   ;;  %vm1498_vm0 = vcmask 39936  }
  0x1d   :  { %v1834_v1 = vld [vmem:[#allocation4 + $0xf8] sm:$0xff]   ;;  %1652 = vmatprep.subr.bf16.mxu0 %v1833_v0  ;;  %v1838_v5 = vld [vmem:[#allocation4 + $0xf0] sm:$0xff]   ;;  %v1841_v8 = vld [vmem:[#allocation4 + $0x68] sm:$0xff]  }
  0x1e   :  { %v1835_v2 = vld [vmem:[#allocation4 + $0x38] sm:$0xff]   ;;  %1674 = vmatprep.subr.bf16.mxu1 %v1834_v1  ;;  %v1839_v6 = vld [vmem:[#allocation4 + $0x30] sm:$0xff]   ;;  %v1842_v9 = vld [vmem:[#allocation4 + $0xe8] sm:$0xff]  }
  0x1f   :  { %v1836_v3 = vld [vmem:[#allocation4 + $0xb8] sm:$0xff]   ;;  %1653 = vmatpush3.bf16.msra.mxu0 %v1835_v2  ;;  %v1840_v7 = vld [vmem:[#allocation4 + $0xb0] sm:$0xff]   ;;  %v1843_v10 = vld [vmem:[#allocation4 + $0x28] sm:$0xff]  }
  0x20   :  { %1675 = vmatpush3.bf16.msra.mxu1 %v1836_v3  ;;  %1654 = vmatprep.subr.bf16.mxu0 %v1837_v4  ;;  %v1844_v11 = vld [vmem:[#allocation4 + $0xa8] sm:$0xff]   ;;  %v1845_v12 = vld [vmem:[#allocation4 + $0x60] sm:$0xff]   ;;  %v1849_v16 = vld [vmem:[#allocation4 + $0x58] sm:$0xff]  }
  0x21   :  { %1676 = vmatprep.subr.bf16.mxu1 %v1838_v5  ;;  %v1846_v13 = vld [vmem:[#allocation4 + $0xe0] sm:$0xff]   ;;  %v1850_v17 = vld [vmem:[#allocation4 + $0xd8] sm:$0xff]   ;;  %v1853_v20 = vld [vmem:[#allocation4 + $0x50] sm:$0xff]  }
  0x22   :  { %v1847_v14 = vld [vmem:[#allocation4 + $0x20] sm:$0xff]   ;;  %v1851_v18 = vld [vmem:[#allocation4 + $0x18] sm:$0xff]   ;;  %v1854_v21 = vld [vmem:[#allocation4 + $0xd0] sm:$0xff]  }
  0x23   :  { %1655 = vmatpush3.bf16.msra.mxu0 %v1839_v6  ;;  %v1848_v15 = vld [vmem:[#allocation4 + $0xa0] sm:$0xff]   ;;  %v1852_v19 = vld [vmem:[#allocation4 + $0x98] sm:$0xff]   ;;  %v1855_v22 = vld [vmem:[#allocation4 + $0x10] sm:$0xff]  }
  0x24   :  { %1677 = vmatpush3.bf16.msra.mxu1 %v1840_v7  ;;  %1656 = vmatprep.subr.bf16.mxu0 %v1841_v8  ;;  %v1856_v23 = vld [vmem:[#allocation4 + $0x90] sm:$0xff]   ;;  %v1857_v24 = vld [vmem:[#allocation4 + $0x48] sm:$0xff]   ;;  %v1861_v28 = vld [vmem:[#allocation4 + $0x40] sm:$0xff]  }
  0x25   :  { %1678 = vmatprep.subr.bf16.mxu1 %v1842_v9  ;;  %v1858_v25 = vld [vmem:[#allocation4 + $0xc8] sm:$0xff]   ;;  %v1862_v29 = vld [vmem:[#allocation4 + $0xc0] sm:$0xff]   ;;  %v1865_v40 = vld [vmem:[#allocation4 + $0x178] sm:$0xff]  }
  0x26   :  { %v1859_v26 = vld [vmem:[#allocation4 + $0x8] sm:$0xff]   ;;  %v1863_v30 = vld [vmem:[#allocation4] sm:$0xff]   ;;  %v1866_v41 = vld [vmem:[#allocation4 + $0x1f8] sm:$0xff]  }
  0x27   :  { %1657 = vmatpush3.bf16.msra.mxu0 %v1843_v10  ;;  %v1860_v27 = vld [vmem:[#allocation4 + $0x88] sm:$0xff]   ;;  %v1864_v31 = vld [vmem:[#allocation4 + $0x80] sm:$0xff]   ;;  %v1867_v42 = vld [vmem:[#allocation4 + $0x138] sm:$0xff]  }
  0x28   :  { %1679 = vmatpush3.bf16.msra.mxu1 %v1844_v11  ;;  %1658 = vmatprep.subr.bf16.mxu0 %v1845_v12  ;;  %v43_v32 = vld [vmem:[#allocation2] sm:$0xff]  ;;  %v44_v34 = vld [vmem:[#allocation2 + $0x8] sm:$0xff]  ;;  %v1868_v43 = vld [vmem:[#allocation4 + $0x1b8] sm:$0xff]  }
  0x29   :  { %1680 = vmatprep.subr.bf16.mxu1 %v1846_v13  ;;  %v51_v33 = vld [vmem:[#allocation2 + $0x40] sm:$0xff]  ;;  %v52_v37 = vld [vmem:[#allocation2 + $0x48] sm:$0xff]  ;;  %v1869_v44 = vld [vmem:[#allocation4 + $0x170] sm:$0xff]  }
  0x2a   :  { %v1508_v35 = vcombine.low %v43_v32, %v51_v33  ;;  %v1509_v36 = vcombine.high %v43_v32, %v51_v33  ;;  %v1510_v38 = vcombine.low %v44_v34, %v52_v37  ;;  %v1511_v39 = vcombine.high %v44_v34, %v52_v37  ;;  %v1870_v45 = vld [vmem:[#allocation4 + $0x1f0] sm:$0xff]   ;;  %v1873_v48 = vld [vmem:[#allocation4 + $0x168] sm:$0xff]   ;;  %v1877_v52 = vld [vmem:[#allocation4 + $0x160] sm:$0xff]  }
  0x2b   :  { %1659 = vmatpush3.bf16.msra.mxu0 %v1847_v14  ;;  %v1871_v46 = vld [vmem:[#allocation4 + $0x130] sm:$0xff]   ;;  %v1874_v49 = vld [vmem:[#allocation4 + $0x1e8] sm:$0xff]   ;;  %v1878_v53 = vld [vmem:[#allocation4 + $0x1e0] sm:$0xff]  }
  0x2c   :  { %1681 = vmatpush3.bf16.msra.mxu1 %v1848_v15  ;;  %1660 = vmatprep.subr.bf16.mxu0 %v1849_v16  ;;  %v1872_v47 = vld [vmem:[#allocation4 + $0x1b0] sm:$0xff]   ;;  %v1875_v50 = vld [vmem:[#allocation4 + $0x128] sm:$0xff]   ;;  %v1879_v54 = vld [vmem:[#allocation4 + $0x120] sm:$0xff]  }
  0x2d   :  { %1682 = vmatprep.subr.bf16.mxu1 %v1850_v17  ;;  %1202 = vmatprep.mubr.bf16.mxu0 %v1509_v36  ;;  %v1876_v51 = vld [vmem:[#allocation4 + $0x1a8] sm:$0xff]   ;;  %v1880_v55 = vld [vmem:[#allocation4 + $0x1a0] sm:$0xff]   ;;  %v1881_v56 = vld [vmem:[#allocation4 + $0x158] sm:$0xff]  }
  0x2e   :  { %1243 = vmatprep.mubr.bf16.mxu1 %v1511_v39  ;;  %v1882_v57 = vld [vmem:[#allocation4 + $0x1d8] sm:$0xff]   ;;  %v1885_v60 = vld [vmem:[#allocation4 + $0x150] sm:$0xff]   ;;  %v1889_v0 = vld [vmem:[#allocation4 + $0x148] sm:$0xff]  }
  0x2f   :  { %1661 = vmatpush3.bf16.msra.mxu0 %v1851_v18  ;;  %v1883_v58 = vld [vmem:[#allocation4 + $0x118] sm:$0xff]   ;;  %v1886_v61 = vld [vmem:[#allocation4 + $0x1d0] sm:$0xff]   ;;  %v1890_v1 = vld [vmem:[#allocation4 + $0x1c8] sm:$0xff]  }
  0x30   :  { %1683 = vmatpush3.bf16.msra.mxu1 %v1852_v19  ;;  %1662 = vmatprep.subr.bf16.mxu0 %v1853_v20  ;;  %v1884_v59 = vld [vmem:[#allocation4 + $0x198] sm:$0xff]   ;;  %v1887_v62 = vld [vmem:[#allocation4 + $0x110] sm:$0xff]   ;;  %v1891_v2 = vld [vmem:[#allocation4 + $0x108] sm:$0xff]  }
  0x31   :  { %1684 = vmatprep.subr.bf16.mxu1 %v1854_v21  ;;  %v1888_v63 = vld [vmem:[#allocation4 + $0x190] sm:$0xff]   ;;  %v1892_v3 = vld [vmem:[#allocation4 + $0x188] sm:$0xff]   ;;  %v1893_v4 = vld [vmem:[#allocation4 + $0x140] sm:$0xff]  }
  0x32   :  { %v1894_v5 = vld [vmem:[#allocation4 + $0x1c0] sm:$0xff]   ;;  %v45_v8 = vld [vmem:[#allocation2 + $0x10] sm:$0xff]  ;;  %v46_v12 = vld [vmem:[#allocation2 + $0x18] sm:$0xff] }
  0x33   :  { %1663 = vmatpush3.bf16.msra.mxu0 %v1855_v22  ;;  %v1895_v6 = vld [vmem:[#allocation4 + $0x100] sm:$0xff]   ;;  %v53_v9 = vld [vmem:[#allocation2 + $0x50] sm:$0xff]  ;;  %v54_v13 = vld [vmem:[#allocation2 + $0x58] sm:$0xff] }
  0x34   :  { %1685 = vmatpush3.bf16.msra.mxu1 %v1856_v23  ;;  %1664 = vmatprep.subr.bf16.mxu0 %v1857_v24  ;;  %v1896_v7 = vld [vmem:[#allocation4 + $0x180] sm:$0xff]   ;;  %v1512_v10 = vcombine.low %v45_v8, %v53_v9  ;;  %v1513_v11 = vcombine.high %v45_v8, %v53_v9  ;;  %v1514_v14 = vcombine.low %v46_v12, %v54_v13  ;;  %v1897_v16 = vld [vmem:[#allocation4 + $0x278] sm:$0xff]   ;;  %v1901_v20 = vld [vmem:[#allocation4 + $0x270] sm:$0xff]  }
  0x35   :  { %1686 = vmatprep.subr.bf16.mxu1 %v1858_v25  ;;  %v1515_v15 = vcombine.high %v46_v12, %v54_v13  ;;  %v1898_v17 = vld [vmem:[#allocation4 + $0x2f8] sm:$0xff]   ;;  %v1902_v21 = vld [vmem:[#allocation4 + $0x2f0] sm:$0xff]   ;;  %v1905_v24 = vld [vmem:[#allocation4 + $0x268] sm:$0xff]  }
  0x36   :  { %v1899_v18 = vld [vmem:[#allocation4 + $0x238] sm:$0xff]   ;;  %v1903_v22 = vld [vmem:[#allocation4 + $0x230] sm:$0xff]   ;;  %v1906_v25 = vld [vmem:[#allocation4 + $0x2e8] sm:$0xff]  }
  0x37   :  { %1665 = vmatpush3.bf16.msra.mxu0 %v1859_v26  ;;  %v1900_v19 = vld [vmem:[#allocation4 + $0x2b8] sm:$0xff]   ;;  %v1904_v23 = vld [vmem:[#allocation4 + $0x2b0] sm:$0xff]   ;;  %v1907_v26 = vld [vmem:[#allocation4 + $0x228] sm:$0xff]  }
  0x38   :  { %1687 = vmatpush3.bf16.msra.mxu1 %v1860_v27  ;;  %1666 = vmatprep.subr.bf16.mxu0 %v1861_v28  ;;  %v1908_v27 = vld [vmem:[#allocation4 + $0x2a8] sm:$0xff]   ;;  %v1909_v28 = vld [vmem:[#allocation4 + $0x260] sm:$0xff]   ;;  %v1913_v32 = vld [vmem:[#allocation4 + $0x258] sm:$0xff]  }
  0x39   :  { %1688 = vmatprep.subr.bf16.mxu1 %v1862_v29  ;;  %v1910_v29 = vld [vmem:[#allocation4 + $0x2e0] sm:$0xff]   ;;  %v1914_v33 = vld [vmem:[#allocation4 + $0x2d8] sm:$0xff]   ;;  %v1917_v36 = vld [vmem:[#allocation4 + $0x250] sm:$0xff]  }
  0x3a   :  { %v1915_v34 = vld [vmem:[#allocation4 + $0x218] sm:$0xff]   ;;  %v1918_v37 = vld [vmem:[#allocation4 + $0x2d0] sm:$0xff]  }
  0x3b   :  { %1667 = vmatpush3.bf16.msra.mxu0 %v1863_v30  ;;  %v1911_v30 = vld [vmem:[#allocation4 + $0x220] sm:$0xff]   ;;  %v1920_v39 = vld [vmem:[#allocation4 + $0x290] sm:$0xff]   ;;  %v1945_v8 = vld [vmem:[#allocation4 + $0x358] sm:$0xff]  }
  0x3c   :  { %1689 = vmatpush3.bf16.msra.mxu1 %v1864_v31  ;;  %1696 = vmatprep.subr.bf16.mxu0 %v1865_v40  ;;  %v1912_v31 = vld [vmem:[#allocation4 + $0x2a0] sm:$0xff]   ;;  %v1921_v40 = vld [vmem:[#allocation4 + $0x248] sm:$0xff]   ;;  %v1946_v9 = vld [vmem:[#allocation4 + $0x3d8] sm:$0xff]  }
  0x3d   :  { %1718 = vmatprep.subr.bf16.mxu1 %v1866_v41  ;;  %v1922_v41 = vld [vmem:[#allocation4 + $0x2c8] sm:$0xff]   ;;  %v1949_v12 = vld [vmem:[#allocation4 + $0x350] sm:$0xff]  }
  0x3e   :  { %1203 = vmatmul.mubr.bf16.vlgmr.msra.gmra.mxu0 %v1508_v35  ;;  %v1916_v35 = vld [vmem:[#allocation4 + $0x298] sm:$0xff]   ;;  %v1950_v13 = vld [vmem:[#allocation4 + $0x3d0] sm:$0xff]  }
  0x3f   :  { %1244 = vmatmul.mubr.bf16.vlgmr.msra.gmra.mxu1 %v1510_v38  ;;  %1697 = vmatpush3.bf16.msra.mxu0 %v1867_v42  ;;  %v1919_v38 = vld [vmem:[#allocation4 + $0x210] sm:$0xff]   ;;  %v1923_v42 = vld [vmem:[#allocation4 + $0x208] sm:$0xff]  }
  0x40   :  { %1719 = vmatpush3.bf16.msra.mxu1 %v1868_v43  ;;  %1698 = vmatprep.subr.bf16.mxu0 %v1869_v44  ;;  %v1924_v43 = vld [vmem:[#allocation4 + $0x288] sm:$0xff]   ;;  %v1925_v44 = vld [vmem:[#allocation4 + $0x240] sm:$0xff]  }
  0x41   :  { %1720 = vmatprep.subr.bf16.mxu1 %v1870_v45  ;;  %1284 = vmatprep.mubr.bf16.mxu0 %v1513_v11  ;;  %v1926_v45 = vld [vmem:[#allocation4 + $0x2c0] sm:$0xff]   ;;  %v1948_v11 = vld [vmem:[#allocation4 + $0x398] sm:$0xff]  }
  0x42   :  { %1325 = vmatprep.mubr.bf16.mxu1 %v1515_v15  ;;  %v1952_v15 = vld [vmem:[#allocation4 + $0x390] sm:$0xff]  }
  0x43   :  { %1699 = vmatpush3.bf16.msra.mxu0 %v1871_v46  ;;  %v1927_v46 = vld [vmem:[#allocation4 + $0x200] sm:$0xff]  }
  0x44   :  { %1721 = vmatpush3.bf16.msra.mxu1 %v1872_v47  ;;  %1700 = vmatprep.subr.bf16.mxu0 %v1873_v48  ;;  %v1928_v47 = vld [vmem:[#allocation4 + $0x280] sm:$0xff]  }
  0x45   :  { %1722 = vmatprep.subr.bf16.mxu1 %v1874_v49  ;;  %v47_v48 = vld [vmem:[#allocation2 + $0x20] sm:$0xff] }
  0x46   :  { %v55_v49 = vld [vmem:[#allocation2 + $0x60] sm:$0xff] }
  0x47   :  { %1701 = vmatpush3.bf16.msra.mxu0 %v1875_v50  ;;  %v48_v50 = vld [vmem:[#allocation2 + $0x28] sm:$0xff] }
  0x48   :  { %1723 = vmatpush3.bf16.msra.mxu1 %v1876_v51  ;;  %1702 = vmatprep.subr.bf16.mxu0 %v1877_v52  ;;  %v56_v51 = vld [vmem:[#allocation2 + $0x68] sm:$0xff]  ;;  %v1516_v52 = vcombine.low %v47_v48, %v55_v49 }
  0x49   :  { %1724 = vmatprep.subr.bf16.mxu1 %v1878_v53  ;;  %v1517_v53 = vcombine.high %v47_v48, %v55_v49  ;;  %v1507_v48 = vld [vmem:[%s2047_s2] ss:$0 sm:$0xff] }
  0x4b   :  { %1703 = vmatpush3.bf16.msra.mxu0 %v1879_v54  ;;  %v1518_v54 = vcombine.low %v48_v50, %v56_v51 }
  0x4c   :  { %1725 = vmatpush3.bf16.msra.mxu1 %v1880_v55  ;;  %1704 = vmatprep.subr.bf16.mxu0 %v1881_v56  ;;  %v1519_v55 = vcombine.high %v48_v50, %v56_v51  ;;  %v1929_v56 = vld [vmem:[#allocation4 + $0x378] sm:$0xff]  }
  0x4d   :  { %1726 = vmatprep.subr.bf16.mxu1 %v1882_v57  ;;  %v1930_v57 = vld [vmem:[#allocation4 + $0x3f8] sm:$0xff]  }
  0x4f   :  { %1705 = vmatpush3.bf16.msra.mxu0 %v1883_v58  ;;  %v1931_v58 = vld [vmem:[#allocation4 + $0x338] sm:$0xff]  }
  0x50   :  { %1727 = vmatpush3.bf16.msra.mxu1 %v1884_v59  ;;  %1706 = vmatprep.subr.bf16.mxu0 %v1885_v60  ;;  %v1932_v59 = vld [vmem:[#allocation4 + $0x3b8] sm:$0xff]   ;;  %v1933_v60 = vld [vmem:[#allocation4 + $0x370] sm:$0xff]  }
  0x51   :  { %1728 = vmatprep.subr.bf16.mxu1 %v1886_v61  ;;  %v1934_v61 = vld [vmem:[#allocation4 + $0x3f0] sm:$0xff]  }
  0x53   :  { %1707 = vmatpush3.bf16.msra.mxu0 %v1887_v62  ;;  %v1935_v62 = vld [vmem:[#allocation4 + $0x330] sm:$0xff]  }
  0x54   :  { %1729 = vmatpush3.bf16.msra.mxu1 %v1888_v63  ;;  %1708 = vmatprep.subr.bf16.mxu0 %v1889_v0  ;;  %v1936_v63 = vld [vmem:[#allocation4 + $0x3b0] sm:$0xff]   ;;  %v1937_v0 = vld [vmem:[#allocation4 + $0x368] sm:$0xff]  }
  0x55   :  { %1730 = vmatprep.subr.bf16.mxu1 %v1890_v1  ;;  %v1938_v1 = vld [vmem:[#allocation4 + $0x3e8] sm:$0xff]  }
  0x57   :  { %1709 = vmatpush3.bf16.msra.mxu0 %v1891_v2  ;;  %v1939_v2 = vld [vmem:[#allocation4 + $0x328] sm:$0xff]  }
  0x58   :  { %1731 = vmatpush3.bf16.msra.mxu1 %v1892_v3  ;;  %1710 = vmatprep.subr.bf16.mxu0 %v1893_v4  ;;  %v1940_v3 = vld [vmem:[#allocation4 + $0x3a8] sm:$0xff]   ;;  %v1941_v4 = vld [vmem:[#allocation4 + $0x360] sm:$0xff]  }
  0x59   :  { %1732 = vmatprep.subr.bf16.mxu1 %v1894_v5  ;;  %v1942_v5 = vld [vmem:[#allocation4 + $0x3e0] sm:$0xff]  }
  0x5b   :  { %1711 = vmatpush3.bf16.msra.mxu0 %v1895_v6  ;;  %v1943_v6 = vld [vmem:[#allocation4 + $0x320] sm:$0xff]  }
  0x5c   :  { %1733 = vmatpush3.bf16.msra.mxu1 %v1896_v7  ;;  %1740 = vmatprep.subr.bf16.mxu0 %v1897_v16  ;;  %v1944_v7 = vld [vmem:[#allocation4 + $0x3a0] sm:$0xff]   ;;  %v1953_v16 = vld [vmem:[#allocation4 + $0x348] sm:$0xff]  }
  0x5d   :  { %1762 = vmatprep.subr.bf16.mxu1 %v1898_v17  ;;  %v1954_v17 = vld [vmem:[#allocation4 + $0x3c8] sm:$0xff]  }
  0x5e   :  { %1285 = vmatmul.mubr.bf16.vlgmr.msra.gmra.mxu0 %v1512_v10  ;;  %v1947_v10 = vld [vmem:[#allocation4 + $0x318] sm:$0xff]  }
  0x5f   :  { %1326 = vmatmul.mubr.bf16.vlgmr.msra.gmra.mxu1 %v1514_v14  ;;  %1741 = vmatpush3.bf16.msra.mxu0 %v1899_v18  ;;  %v1951_v14 = vld [vmem:[#allocation4 + $0x310] sm:$0xff]   ;;  %v1955_v18 = vld [vmem:[#allocation4 + $0x308] sm:$0xff]  }
  0x60   :  { %1763 = vmatpush3.bf16.msra.mxu1 %v1900_v19  ;;  %1742 = vmatprep.subr.bf16.mxu0 %v1901_v20  ;;  %v1956_v19 = vld [vmem:[#allocation4 + $0x388] sm:$0xff]   ;;  %v1957_v20 = vld [vmem:[#allocation4 + $0x340] sm:$0xff]  }
  0x61   :  { %1764 = vmatprep.subr.bf16.mxu1 %v1902_v21  ;;  %1366 = vmatprep.mubr.bf16.mxu0 %v1517_v53  ;;  %v1958_v21 = vld [vmem:[#allocation4 + $0x3c0] sm:$0xff]  }
  0x62   :  { %1407 = vmatprep.mubr.bf16.mxu1 %v1519_v55 }
  0x63   :  { %1743 = vmatpush3.bf16.msra.mxu0 %v1903_v22  ;;  %v1959_v22 = vld [vmem:[#allocation4 + $0x300] sm:$0xff]  }
  0x64   :  { %1765 = vmatpush3.bf16.msra.mxu1 %v1904_v23  ;;  %1744 = vmatprep.subr.bf16.mxu0 %v1905_v24  ;;  %v1960_v23 = vld [vmem:[#allocation4 + $0x380] sm:$0xff]   ;;  %v49_v24 = vld [vmem:[#allocation2 + $0x30] sm:$0xff] }
  0x65   :  { %1766 = vmatprep.subr.bf16.mxu1 %v1906_v25  ;;  %v57_v25 = vld [vmem:[#allocation2 + $0x70] sm:$0xff] }
  0x67   :  { %1745 = vmatpush3.bf16.msra.mxu0 %v1907_v26  ;;  %v50_v26 = vld [vmem:[#allocation2 + $0x38] sm:$0xff] }
  0x68   :  { %1767 = vmatpush3.bf16.msra.mxu1 %v1908_v27  ;;  %1746 = vmatprep.subr.bf16.mxu0 %v1909_v28  ;;  %v1520_v27 = vcombine.low %v49_v24, %v57_v25  ;;  %v1521_v28 = vcombine.high %v49_v24, %v57_v25 }
  0x69   :  { %1768 = vmatprep.subr.bf16.mxu1 %v1910_v29  ;;  %v58_v29 = vld [vmem:[#allocation2 + $0x78] sm:$0xff] }
  0x6b   :  { %1747 = vmatpush3.bf16.msra.mxu0 %v1911_v30  ;;  %v1522_v30 = vcombine.low %v50_v26, %v58_v29 }
  0x6c   :  { %1769 = vmatpush3.bf16.msra.mxu1 %v1912_v31  ;;  %1748 = vmatprep.subr.bf16.mxu0 %v1913_v32  ;;  %v1523_v31 = vcombine.high %v50_v26, %v58_v29 }
  0x6d   :  { %1770 = vmatprep.subr.bf16.mxu1 %v1914_v33 }
  0x6f   :  { %1749 = vmatpush3.bf16.msra.mxu0 %v1915_v34 }
  0x70   :  { %1771 = vmatpush3.bf16.msra.mxu1 %v1916_v35  ;;  %1750 = vmatprep.subr.bf16.mxu0 %v1917_v36 }
  0x71   :  { %1772 = vmatprep.subr.bf16.mxu1 %v1918_v37 }
  0x73   :  { %1751 = vmatpush3.bf16.msra.mxu0 %v1919_v38 }
  0x74   :  { %1773 = vmatpush3.bf16.msra.mxu1 %v1920_v39  ;;  %1752 = vmatprep.subr.bf16.mxu0 %v1921_v40 }
  0x75   :  { %1774 = vmatprep.subr.bf16.mxu1 %v1922_v41 }
  0x77   :  { %1753 = vmatpush3.bf16.msra.mxu0 %v1923_v42 }
  0x78   :  { %1775 = vmatpush3.bf16.msra.mxu1 %v1924_v43  ;;  %1754 = vmatprep.subr.bf16.mxu0 %v1925_v44 }
  0x79   :  { %1776 = vmatprep.subr.bf16.mxu1 %v1926_v45 }
  0x7b   :  { %1755 = vmatpush3.bf16.msra.mxu0 %v1927_v46 }
  0x7c   :  { %1777 = vmatpush3.bf16.msra.mxu1 %v1928_v47  ;;  %1784 = vmatprep.subr.bf16.mxu0 %v1929_v56 }
  0x7d   :  { %1806 = vmatprep.subr.bf16.mxu1 %v1930_v57 }
  0x7e   :  { %1367 = vmatmul.mubr.bf16.vlgmr.msra.gmra.mxu0 %v1516_v52 }
  0x7f   :  { %1408 = vmatmul.mubr.bf16.vlgmr.msra.gmra.mxu1 %v1518_v54  ;;  %1785 = vmatpush3.bf16.msra.mxu0 %v1931_v58 }
  0x80   :  { %1807 = vmatpush3.bf16.msra.mxu1 %v1932_v59  ;;  %1786 = vmatprep.subr.bf16.mxu0 %v1933_v60 }
  0x81   :  { %1808 = vmatprep.subr.bf16.mxu1 %v1934_v61  ;;  %1448 = vmatprep.mubr.bf16.mxu0 %v1521_v28 }
  0x82   :  { %1489 = vmatprep.mubr.bf16.mxu1 %v1523_v31 }
  0x83   :  { %1787 = vmatpush3.bf16.msra.mxu0 %v1935_v62 }
  0x84   :  { %1809 = vmatpush3.bf16.msra.mxu1 %v1936_v63  ;;  %1788 = vmatprep.subr.bf16.mxu0 %v1937_v0 }
  0x85   :  { %1810 = vmatprep.subr.bf16.mxu1 %v1938_v1 }
  0x87   :  { %1789 = vmatpush3.bf16.msra.mxu0 %v1939_v2 }
  0x88   :  { %1811 = vmatpush3.bf16.msra.mxu1 %v1940_v3  ;;  %1790 = vmatprep.subr.bf16.mxu0 %v1941_v4 }
  0x89   :  { %1812 = vmatprep.subr.bf16.mxu1 %v1942_v5 }
  0x8b   :  { %1791 = vmatpush3.bf16.msra.mxu0 %v1943_v6 }
  0x8c   :  { %1813 = vmatpush3.bf16.msra.mxu1 %v1944_v7  ;;  %1792 = vmatprep.subr.bf16.mxu0 %v1945_v8 }
  0x8d   :  { %1814 = vmatprep.subr.bf16.mxu1 %v1946_v9 }
  0x8f   :  { %1793 = vmatpush3.bf16.msra.mxu0 %v1947_v10 }
  0x90   :  { %1815 = vmatpush3.bf16.msra.mxu1 %v1948_v11  ;;  %1794 = vmatprep.subr.bf16.mxu0 %v1949_v12 }
  0x91   :  { %1816 = vmatprep.subr.bf16.mxu1 %v1950_v13 }
  0x93   :  { %1795 = vmatpush3.bf16.msra.mxu0 %v1951_v14 }
  0x94   :  { %1817 = vmatpush3.bf16.msra.mxu1 %v1952_v15  ;;  %1796 = vmatprep.subr.bf16.mxu0 %v1953_v16 }
  0x95   :  { %1818 = vmatprep.subr.bf16.mxu1 %v1954_v17 }
  0x97   :  { %1797 = vmatpush3.bf16.msra.mxu0 %v1955_v18 }
  0x98   :  { %1819 = vmatpush3.bf16.msra.mxu1 %v1956_v19  ;;  %1798 = vmatprep.subr.bf16.mxu0 %v1957_v20 }
  0x99   :  { %1820 = vmatprep.subr.bf16.mxu1 %v1958_v21 }
  0x9b   :  { %1799 = vmatpush3.bf16.msra.mxu0 %v1959_v22 }
  0x9c   :  { %1821 = vmatpush3.bf16.msra.mxu1 %v1960_v23 }
  0x9e   :  { %1449 = vmatmul.mubr.bf16.vlgmr.msra.gmra.mxu0 %v1520_v27 }
  0x9f   :  { %1490 = vmatmul.mubr.bf16.vlgmr.msra.gmra.mxu1 %v1522_v30 }
  0xfe   :  { %v1668_v32 = vpop.f32.mrf.mxu0 }
  0xff   :  { %v1690_v33 = vpop.f32.mrf.mxu1 }
 0x100   :  { %v1669_v34 = vpop.f32.mrf.mxu0 }
 0x101   :  { %v1691_v35 = vpop.f32.mrf.mxu1  ;;  %v1670_v47 = vadd.f32 %v1669_v34, %v1668_v32 }
 0x102   :  { %v1671_v36 = vpop.f32.mrf.mxu0  ;;  %v1692_v52 = vadd.f32 %v1691_v35, %v1690_v33 }
 0x103   :  { %v1693_v37 = vpop.f32.mrf.mxu1  ;;  %v1205_v51 = vadd.f32 %v1670_v47, %v1507_v48 }
 0x104   :  { %v1672_v38 = vpop.f32.mrf.mxu0 }
 0x105   :  { %v1694_v40 = vpop.f32.mrf.mxu1  ;;  %v1673_v53 = vadd.f32 %v1672_v38, %v1671_v36  ;;  %v1246_v57 = vadd.f32 %v1692_v52, %v1205_v51 }
 0x106   :  { %v1695_v61 = vadd.f32 %v1694_v40, %v1693_v37 }
 0x107   :  { %v1208_v58 = vadd.f32 %v1673_v53, %v1507_v48 }
 0x109   :  { %v1249_v1 = vadd.f32 %v1695_v61, %v1208_v58 }
 0x11e   :  { %v1712_v39 = vpop.f32.mrf.mxu0 }
 0x11f   :  { %v1734_v41 = vpop.f32.mrf.mxu1 }
 0x120   :  { %v1713_v42 = vpop.f32.mrf.mxu0 }
 0x121   :  { %v1735_v43 = vpop.f32.mrf.mxu1  ;;  %v1714_v56 = vadd.f32 %v1713_v42, %v1712_v39 }
 0x122   :  { %v1715_v44 = vpop.f32.mrf.mxu0  ;;  %v1736_v63 = vadd.f32 %v1735_v43, %v1734_v41 }
 0x123   :  { %v1737_v45 = vpop.f32.mrf.mxu1  ;;  %v1287_v62 = vadd.f32 %v1714_v56, %v1246_v57 }
 0x124   :  { %v1716_v46 = vpop.f32.mrf.mxu0 }
 0x125   :  { %v1738_v50 = vpop.f32.mrf.mxu1  ;;  %v1717_v0 = vadd.f32 %v1716_v46, %v1715_v44  ;;  %v1328_v5 = vadd.f32 %v1736_v63, %v1287_v62 }
 0x126   :  { %v1739_v7 = vadd.f32 %v1738_v50, %v1737_v45 }
 0x127   :  { %v1290_v6 = vadd.f32 %v1717_v0, %v1249_v1 }
 0x129   :  { %v1331_v13 = vadd.f32 %v1739_v7, %v1290_v6 }
 0x13e   :  { %v1756_v49 = vpop.f32.mrf.mxu0 }
 0x13f   :  { %v1778_v54 = vpop.f32.mrf.mxu1 }
 0x140   :  { %v1757_v55 = vpop.f32.mrf.mxu0 }
 0x141   :  { %v1779_v59 = vpop.f32.mrf.mxu1  ;;  %v1758_v2 = vadd.f32 %v1757_v55, %v1756_v49 }
 0x142   :  { %v1759_v60 = vpop.f32.mrf.mxu0  ;;  %v1780_v9 = vadd.f32 %v1779_v59, %v1778_v54 }
 0x143   :  { %v1781_v3 = vpop.f32.mrf.mxu1  ;;  %v1369_v8 = vadd.f32 %v1758_v2, %v1328_v5 }
 0x144   :  { %v1760_v4 = vpop.f32.mrf.mxu0 }
 0x145   :  { %v1761_v10 = vadd.f32 %v1760_v4, %v1759_v60  ;;  %v1782_v11 = vpop.f32.mrf.mxu1  ;;  %v1410_v16 = vadd.f32 %v1780_v9, %v1369_v8 }
 0x146   :  { %v1783_v21 = vadd.f32 %v1782_v11, %v1781_v3 }
 0x147   :  { %v1372_v17 = vadd.f32 %v1761_v10, %v1331_v13 }
 0x149   :  { %v1413_v26 = vadd.f32 %v1783_v21, %v1372_v17 }
 0x15e   :  { %v1800_v12 = vpop.f32.mrf.mxu0 }
 0x15f   :  { %v1822_v14 = vpop.f32.mrf.mxu1 }
 0x160   :  { %v1801_v15 = vpop.f32.mrf.mxu0 }
 0x161   :  { %v1802_v18 = vadd.f32 %v1801_v15, %v1800_v12  ;;  %v1823_v19 = vpop.f32.mrf.mxu1 }
 0x162   :  { %v1803_v20 = vpop.f32.mrf.mxu0  ;;  %v1824_v23 = vadd.f32 %v1823_v19, %v1822_v14 }
 0x163   :  { %v1451_v22 = vadd.f32 %v1802_v18, %v1410_v16  ;;  %v1825_v24 = vpop.f32.mrf.mxu1 }
 0x164   :  { %v1804_v25 = vpop.f32.mrf.mxu0 }
 0x165   :  { %v1492_v27 = vadd.f32 %v1824_v23, %v1451_v22  ;;  %v1805_v28 = vadd.f32 %v1804_v25, %v1803_v20  ;;  %v1826_v29 = vpop.f32.mrf.mxu1 }
 0x166   :  { %v1827_v31 = vadd.f32 %v1826_v29, %v1825_v24 }
 0x167   :  { %1499 = vst.msk [vmem:[%s2048_s3] sm:$0xff] %vm1498_vm0, %v1492_v27  ;;  %v1454_v30 = vadd.f32 %v1805_v28, %v1413_v26 }
 0x169   :  { %v1495_v32 = vadd.f32 %v1827_v31, %v1454_v30 }
 0x16b   :  { %1500 = vst.msk [vmem:[%s2048_s3 + $0x8] sm:$0xff] %vm1498_vm0, %v1495_v32 }
 0x16c   :  { %1505 = vsyncpa [#allocation3], 1 }
 0x16d   :  { %1506 = vsyncpa [#allocation5], 1 }

</bundles_post_ra>
